<compile_context>
chip_gen: v7x
topology: tpu7x:2x2x1
jax: 0.10.0
libtpu: 0.0.40
codegen_flags: <defaults>
</compile_context>

<pallas_src>
import jax
import jax.numpy as jnp
from jax import lax
from jax.experimental import pallas as pl
from jax.experimental.pallas import tpu as pltpu


# ---------------------------------------------------------------------------
# Primary kernel: SMEM tokens + direct row gather + column-only output stores.
#   tok0_ref : (B, 1)        int32  SMEM   initial tokens (last prompt token per row)
#   embed_ref: (V//8, 8, H)  f32    VMEM   embedding table (resident, fetched once)
#   w_ref    : (H, V)        f32    VMEM   LM head (resident, fetched once)
#   out_ref  : (B, T)        int32  SMEM   response buffer (scalar stores, one column/step)
#   scratch  : tok_sc (B,1) i32 SMEM, nxt_vmem (B,1) i32 VMEM, x_vmem (B,H) f32 VMEM, DMA sem
# ---------------------------------------------------------------------------
def _decode_kernel_rows(tok0_ref, embed_ref, w_ref, out_ref,
                        tok_sc, nxt_vmem, x_vmem, dma_sem):
    B, T = out_ref.shape
    _, blk, H = embed_ref.shape          # blk == 8 (sublane block of the reshaped table)
    _, V = w_ref.shape

    # batch_input = last prompt token (SMEM scalar state, carried across decode steps)
    for b in range(B):
        tok_sc[b, 0] = tok0_ref[b, 0]

    # Hoisted iotas (JAX does not CSE broadcast_in_dim inside the loop).
    vocab_iota = lax.broadcasted_iota(jnp.int32, (B, V), 1)
    sub_iota = lax.broadcasted_iota(jnp.int32, (blk, H), 0)

    def step(t, carry):
        # --- embedding row gather: one dynamic (8, H) tile load per batch row ---
        for b in range(B):
            tok = tok_sc[b, 0]                       # scalar (SMEM)
            q = tok // blk
            r = tok - q * blk
            tile = embed_ref[q]                      # (8, H)   dynamic leading-axis load
            row = jnp.where(sub_iota == r, tile, 0.0)
            x_vmem[b, :] = jnp.sum(row, axis=0)      # exact: one selected row + zeros
        x = x_vmem[...]                              # (B, H)

        # --- LM head (temperature scale dropped: argmax-invariant for T > 0) ---
        logits = jnp.dot(x.astype(w_ref.dtype), w_ref[...],
                         preferred_element_type=jnp.float32)          # (B, V)

        # --- first-occurrence argmax over the vocabulary ---
        row_max = jnp.max(logits, axis=-1, keepdims=True)
        cand = jnp.where(logits == row_max, vocab_iota, jnp.int32(V))
        nxt = jnp.min(cand, axis=-1, keepdims=True).astype(jnp.int32)  # (B, 1)

        # --- vector -> scalar crossing: tiny VMEM -> SMEM DMA of the next tokens ---
        nxt_vmem[...] = nxt
        cp = pltpu.make_async_copy(nxt_vmem, tok_sc, dma_sem)
        cp.start()
        cp.wait()

        # --- response[:, t] = next_token : B scalar stores (only this step's column) ---
        for b in range(B):
            out_ref[b, t] = tok_sc[b, 0]
        return carry

    lax.fori_loop(0, T, step, 0)


# ---------------------------------------------------------------------------
# Fallback kernel: same fused in-kernel decode loop, but the gather is the (exact)
# one-hot MXU matmul and state is carried as loop values (pure vector ops only).
# ---------------------------------------------------------------------------
def _decode_kernel_onehot(tok0_ref, embed_ref, w_ref, out_ref):
    B, T = out_ref.shape
    V, H = embed_ref.shape

    vocab_iota = lax.broadcasted_iota(jnp.int32, (B, V), 1)
    col_iota = lax.broadcasted_iota(jnp.int32, (B, T), 1)

    def step(t, carry):
        tok, resp = carry
        onehot = (vocab_iota == tok).astype(jnp.float32)                       # (B, V)
        x = jnp.dot(onehot, embed_ref[...], preferred_element_type=jnp.float32)  # (B, H)
        logits = jnp.dot(x.astype(w_ref.dtype), w_ref[...],
                         preferred_element_type=jnp.float32)                   # (B, V)
        row_max = jnp.max(logits, axis=-1, keepdims=True)
        cand = jnp.where(logits == row_max, vocab_iota, jnp.int32(V))
        nxt = jnp.min(cand, axis=-1, keepdims=True).astype(jnp.int32)          # (B, 1)
        resp = jnp.where(col_iota == t, jnp.broadcast_to(nxt, (B, T)), resp)
        return nxt, resp

    tok0 = tok0_ref[...]
    _, resp = lax.fori_loop(0, T, step, (tok0, jnp.zeros((B, T), jnp.int32)))
    out_ref[...] = resp        # single final store of the response


# ---------------------------------------------------------------------------
# Wrapper: mirrors the GREEDY max_new_tokens loop of InferenceAgent.forward.
# ---------------------------------------------------------------------------
def generate_greedy(input_ids, embed, w_out, temperature, max_new_tokens, *,
                    gather="auto", lm_head_dtype=None):
    """Greedy decode: returns (B, max_new_tokens) int32 next-token ids."""
    assert temperature > 0.0, "dropping the temperature scale is argmax-safe only for T > 0"
    assert gather in ("auto", "rows", "onehot")
    B = input_ids.shape[0]
    V, H = embed.shape
    H2, V2 = w_out.shape
    assert (H2, V2) == (H, V)
    assert B % 8 == 0 and H % 128 == 0 and V % 128 == 0
    T = int(max_new_tokens)

    w = w_out if lm_head_dtype is None else w_out.astype(lm_head_dtype)
    tok0 = input_ids[:, -1:].astype(jnp.int32)   # the model re-consumes only the last / next token

    # Generation-aware VMEM budget (no grid -> weights are single-buffered).
    resident_bytes = embed.nbytes + w.nbytes
    try:
        phys_vmem = int(pltpu.get_tpu_info().vmem_capacity_bytes)   # 64 MiB v7x, 128 MiB v5e/v6e
    except Exception:
        phys_vmem = 64 << 20                                        # conservative (v7x)
    budget = (phys_vmem * 9) // 10
    assert resident_bytes + (4 << 20) <= budget, (
        "embedding table + LM head must fit in VMEM for the resident-weight decode kernel")
    vmem_limit = int(min(budget, max(resident_bytes + (16 << 20), 32 << 20)))
    cparams = pltpu.CompilerParams(vmem_limit_bytes=vmem_limit)

    def call_rows():
        return pl.pallas_call(
            _decode_kernel_rows,
            out_shape=jax.ShapeDtypeStruct((B, T), jnp.int32),
            in_specs=[
                pl.BlockSpec(memory_space=pltpu.MemorySpace.SMEM),   # initial tokens (scalars)
                pl.BlockSpec(memory_space=pltpu.MemorySpace.VMEM),   # embedding table (resident)
                pl.BlockSpec(memory_space=pltpu.MemorySpace.VMEM),   # LM head (resident)
            ],
            out_specs=pl.BlockSpec(memory_space=pltpu.MemorySpace.SMEM),
            scratch_shapes=[
                pltpu.SMEM((B, 1), jnp.int32),      # carried last_tok (scalar state)
                pltpu.VMEM((B, 1), jnp.int32),      # argmax result staging for the tiny DMA
                pltpu.VMEM((B, H), jnp.float32),    # gathered embedding rows
                pltpu.SemaphoreType.DMA,            # VMEM -> SMEM copy semaphore
            ],
            compiler_params=cparams,
        )(tok0, embed.reshape(V // 8, 8, H), w)

    def call_onehot():
        return pl.pallas_call(
            _decode_kernel_onehot,
            out_shape=jax.ShapeDtypeStruct((B, T), jnp.int32),
            in_specs=[pl.BlockSpec(memory_space=pltpu.MemorySpace.VMEM)] * 3,
            out_specs=pl.BlockSpec(memory_space=pltpu.MemorySpace.VMEM),
            compiler_params=cparams,
        )(tok0, embed, w)

    if gather == "rows":
        return call_rows()
    if gather == "onehot":
        return call_onehot()
    # auto: prefer the row-gather fast path, fall back to the known-good one-hot variant.
    try:
        out = call_rows()
        jax.block_until_ready(out)
        return out
    except Exception:
        out = call_onehot()
        jax.block_until_ready(out)
        return out


def generate_greedy_ref(input_ids, embed, w_out, temperature, max_new_tokens):
    """Pure-JAX reference mirroring the PyTorch loop (with temperature scaling)."""
    last_tok = input_ids[:, -1]
    pieces = []
    for _ in range(max_new_tokens):
        logits = (embed[last_tok] @ w_out) / temperature
        nxt = jnp.argmax(logits, axis=-1).astype(jnp.int32)[:, None]
        pieces.append(nxt)
        last_tok = nxt[:, 0]
    return jnp.concatenate(pieces, axis=1)


if __name__ == "__main__":
    B, S, H, V = 8, 8, 128, 512            # batch, prompt len, hidden, vocab
    max_new_tokens = 4
    temperature = 0.7

    key = jax.random.PRNGKey(0)
    k_emb, k_w, k_tok = jax.random.split(key, 3)

    # Deterministic synthetic "model" parameters (embedding table + LM head).
    embed = jax.random.normal(k_emb, (V, H), dtype=jnp.float32) * 0.02
    w_out = jax.random.normal(k_w, (H, V), dtype=jnp.float32) * 0.02

    # Deterministic synthetic tokenized + padded batch (stands in for tokenizer.encode + pad).
    input_ids = jax.random.randint(k_tok, (B, S), 0, V, dtype=jnp.int32)

    expected = generate_greedy_ref(input_ids, embed, w_out, temperature, max_new_tokens)

    response = generate_greedy(input_ids, embed, w_out, temperature, max_new_tokens)
    response = jax.block_until_ready(response)
    if response.shape != expected.shape or not bool(jnp.all(response == expected)):
        # Safety net: use the pure vector-domain variant if the fast path misbehaves.
        response = generate_greedy(input_ids, embed, w_out, temperature, max_new_tokens,
                                   gather="onehot")
        response = jax.block_until_ready(response)

    assert response.shape == (B, max_new_tokens)
    assert bool(jnp.all(response == expected))

    print("KERNEL_OK")
</pallas_src>

<mosaic_0001>
module attributes {stable_mosaic.version = 11 : i64} {
  func.func @_decode_kernel_onehot(%arg0: memref<8x1xi32, #tpu.memory_space<vmem>>, %arg1: memref<512x128xf32, #tpu.memory_space<vmem>>, %arg2: memref<128x512xf32, #tpu.memory_space<vmem>>, %arg3: memref<8x4xi32, #tpu.memory_space<vmem>>) attributes {dimension_semantics = [], scalar_prefetch = 0 : i64, scratch_operands = 0 : i64, tpu.core_type = #tpu.core_type<tc>} {
    %0 = tpu.iota {dimensions = array<i32: 1>} : vector<8x512xi32>
    %1 = tpu.iota {dimensions = array<i32: 1>} : vector<8x4xi32>
    %c0 = arith.constant 0 : index
    %c0_0 = arith.constant 0 : index
    %2 = vector.load %arg0[%c0, %c0_0] : memref<8x1xi32, #tpu.memory_space<vmem>>, vector<8x1xi32>
    %c0_i32 = arith.constant 0 : i32
    %3 = vector.broadcast %c0_i32 : i32 to vector<8x4xi32>
    %c0_i32_1 = arith.constant 0 : i32
    %c4_i32 = arith.constant 4 : i32
    %4 = arith.addi %c0_i32_1, %c4_i32 : i32
    %c1_i32 = arith.constant 1 : i32
    %5:2 = scf.for %arg4 = %c0_i32_1 to %4 step %c1_i32 iter_args(%arg5 = %2, %arg6 = %3) -> (vector<8x1xi32>, vector<8x4xi32>)  : i32 {
      %7 = vector.broadcast %arg5 : vector<8x1xi32> to vector<8x512xi32>
      %8 = arith.cmpi eq, %0, %7 : vector<8x512xi32>
      %9 = arith.extui %8 : vector<8x512xi1> to vector<8x512xi32>
      %10 = arith.sitofp %9 : vector<8x512xi32> to vector<8x512xf32>
      %c0_5 = arith.constant 0 : index
      %c0_6 = arith.constant 0 : index
      %11 = vector.load %arg1[%c0_5, %c0_6] : memref<512x128xf32, #tpu.memory_space<vmem>>, vector<512x128xf32>
      %cst = arith.constant dense<0.000000e+00> : vector<8x128xf32>
      %12 = tpu.matmul %10, %11, %cst {dimension_numbers = #tpu.dot_dimension_numbers<[1], [0], [0], [1], [0, 0, 1, 1], [], []>} : vector<8x512xf32>, vector<512x128xf32>, vector<8x128xf32> -> vector<8x128xf32>
      %c0_7 = arith.constant 0 : index
      %c0_8 = arith.constant 0 : index
      %13 = vector.load %arg2[%c0_7, %c0_8] : memref<128x512xf32, #tpu.memory_space<vmem>>, vector<128x512xf32>
      %cst_9 = arith.constant dense<0.000000e+00> : vector<8x512xf32>
      %14 = tpu.matmul %12, %13, %cst_9 {dimension_numbers = #tpu.dot_dimension_numbers<[1], [0], [0], [1], [0, 0, 1, 1], [], []>} : vector<8x128xf32>, vector<128x512xf32>, vector<8x512xf32> -> vector<8x512xf32>
      %cst_10 = arith.constant dense<0xFF800000> : vector<8xf32>
      %15 = vector.multi_reduction <maximumf>, %14, %cst_10 [1] : vector<8x512xf32> to vector<8xf32>
      %16 = vector.shape_cast %15 : vector<8xf32> to vector<8x1xf32>
      %17 = vector.broadcast %16 : vector<8x1xf32> to vector<8x512xf32>
      %18 = arith.cmpf oeq, %14, %17 : vector<8x512xf32>
      %c512_i32 = arith.constant 512 : i32
      %19 = vector.broadcast %c512_i32 : i32 to vector<8x512xi32>
      %20 = arith.select %18, %0, %19 : vector<8x512xi1>, vector<8x512xi32>
      %cst_11 = arith.constant dense<2147483647> : vector<8xi32>
      %21 = vector.multi_reduction <minsi>, %20, %cst_11 [1] : vector<8x512xi32> to vector<8xi32>
      %22 = vector.shape_cast %21 : vector<8xi32> to vector<8x1xi32>
      %23 = vector.broadcast %arg4 : i32 to vector<8x4xi32>
      %24 = arith.cmpi eq, %1, %23 : vector<8x4xi32>
      %25 = vector.shape_cast %22 : vector<8x1xi32> to vector<8x1xi32>
      %26 = vector.broadcast %25 : vector<8x1xi32> to vector<8x4xi32>
      %27 = arith.select %24, %26, %arg6 : vector<8x4xi1>, vector<8x4xi32>
      scf.yield %22, %27 : vector<8x1xi32>, vector<8x4xi32>
    }
    %c4_i32_2 = arith.constant 4 : i32
    %c0_3 = arith.constant 0 : index
    %c0_4 = arith.constant 0 : index
    %6 = vector.load %arg3[%c0_3, %c0_4] : memref<8x4xi32, #tpu.memory_space<vmem>>, vector<8x4xi32>
    tpu.vector_store %arg3[%c0_3, %c0_4], %5#1 {strides = array<i32>} : memref<8x4xi32, #tpu.memory_space<vmem>>, vector<8x4xi32>,
    return
  }
}

</mosaic_0001>

<bundles_post_ra>
// kernel: tpu_custom_call.1
= control target key start
LH: loop header
LB: loop body
LE: loop exit
PB: predicated region body
PF: predicated region fallthrough
CT: control target
= control target key end

     0   :  { %8 = vsyncpa [#allocation3], 0  ;;  %s949_s0 = inlined_call_operand.vmem [shape: s32[8,1], index: 0, kind: input, shape index: {}]   ;;  %s950_s1 = inlined_call_operand.hbm [shape: f32[512,128], index: 1, kind: input, shape index: {}]   ;;  %s951_s2 = inlined_call_operand.hbm [shape: f32[128,512], index: 2, kind: input, shape index: {}]   ;;  %s952_s3 = inlined_call_operand.vmem [shape: s32[8,4], index: 3, kind: output, shape index: {}]  }
   0x1   :  { %9 = vsyncpa [#allocation5], 0  ;;  %s848_s12 = smov [#allocation2]   ;;  %s776_s16 = scalar_lea.hbm %s950_s1, 8192 }
   0x2   :  { %s17_s13 = sshll.u32 %s848_s12, 4  ;;  %p777_p0 = scmp.ne.s32.totalorder %s950_s1, %s776_s16  ;;  %s18_s13 = int_to_ptr.vmem [resolvable:$true] %s17_s13 }
   0x3   :  { %p780_p1 = scmp.lt.u32.totalorder %s776_s16, %s950_s1 }
   0x5   :  { %p782_p2 = pnand %p780_p1, %p777_p0 }
   0x7   :  { %785 = shalt.err (!%p782_p2)
}
   0x8   :  { %s786_s21 = scalar_lea.vmem %s18_s13, 8192  ;;  %p791_p4 = scmp.lt.s32.totalorder %s18_s13, %s18_s13 }
   0x9   :  { %p787_p3 = scmp.ne.s32.totalorder %s18_s13, %s786_s21  ;;  %p792_p5 = scmp.lt.s32.totalorder %s786_s21, %s786_s21 }
   0xb   :  { %p793_p6 = por %p792_p5, %p791_p4 }
   0xd   :  { %p794_p7 = pnand %p793_p6, %p787_p3 }
   0xf   :  { %797 = shalt.err (!%p794_p7)
}
  0x10   :  { %s849_s22 = smov 128   ;;  %s850_s23 = smov 8  }
  0x11   :  { %23 = dma.hbm_to_vmem [thread:$0]  %s950_s1, 8192, %s18_s13, [#allocation3], %s849_s22, %s849_s22, %s850_s23  }
  0x12   :  { %s851_s26 = smov [#allocation4]   ;;  %s798_s30 = scalar_lea.hbm %s951_s2, 8192 }
  0x13   :  { %s29_s27 = sshll.u32 %s851_s26, 4  ;;  %p799_p8 = scmp.ne.s32.totalorder %s951_s2, %s798_s30  ;;  %s30_s27 = int_to_ptr.vmem [resolvable:$true] %s29_s27 }
  0x14   :  { %p802_p9 = scmp.lt.u32.totalorder %s798_s30, %s951_s2 }
  0x16   :  { %p804_p10 = pnand %p802_p9, %p799_p8 }
  0x18   :  { %807 = shalt.err (!%p804_p10)
}
  0x19   :  { %s808_s8 = scalar_lea.vmem %s30_s27, 8192  ;;  %p813_p12 = scmp.lt.s32.totalorder %s30_s27, %s30_s27 }
  0x1a   :  { %p809_p11 = scmp.ne.s32.totalorder %s30_s27, %s808_s8  ;;  %p814_p13 = scmp.lt.s32.totalorder %s808_s8, %s808_s8 }
  0x1c   :  { %p815_p0 = por %p814_p13, %p813_p12 }
  0x1e   :  { %p816_p1 = pnand %p815_p0, %p809_p11 }
  0x20   :  { %819 = shalt.err (!%p816_p1)
}
  0x21   :  { %s852_s1 = smov 512   ;;  %s853_s9 = smov 32  }
  0x22   :  { %35 = dma.hbm_to_vmem [thread:$0]  %s951_s2, 8192, %s30_s27, [#allocation5], %s852_s1, %s852_s1, %s853_s9  }
  0x23   :  { %832 = dma.done.wait [#allocation3], 8192  }
  0x24   :  { %833 = vsyncadd [#allocation3], 4294959104 }
  0x25   :  { %834 = dma.done.wait [#allocation5], 8192  }
  0x26   :  { %835 = vsyncadd [#allocation5], 4294959104  ;;  %v42_v0 = vlaneseq  ;;  %v47_v5 = vld [vmem:[%s949_s0] sm:$0xff]   ;;  %v915_v6 = vmov 0   ;;  %s919_s2 = smov 0  }
  0x28   :  { %v901_v1 = vand.u32 127, %v42_v0 }
  0x2a   :  { %v904_v2 = vadd.s32 128, %v901_v1  ;;  %v907_v3 = vadd.s32 256, %v901_v1  ;;  %v910_v4 = vadd.s32 384, %v901_v1 }
  0x2b LB: > { %v87_v7 = vld [vmem:[#allocation2 + $0x80] sm:$0xff]  ;;  %v88_v8 = vld [vmem:[#allocation2 + $0x88] sm:$0xff]  ;;  %v854_v10 = vmov 0   ;;  %v89_v19 = vld [vmem:[#allocation2 + $0x90] sm:$0xff]  ;;  %s846_s2 = sphi %s919_s2, %s53_s2   ;;  %v842_v5 = vphi %v47_v5, %v513_v5   ;;  %v838_v6 = vphi %v915_v6, %v953_v6  }
  0x2c   : > { %v119_v9 = vld [vmem:[#allocation2 + $0x180] sm:$0xff]  ;;  %775 = vset.pattern.permute.xlu0 %v854_v10  ;;  %v614_v11 = vpack.c.bf16 %v88_v8, %v87_v7  ;;  %v120_v12 = vld [vmem:[#allocation2 + $0x188] sm:$0xff]  ;;  %v90_v21 = vld [vmem:[#allocation2 + $0x98] sm:$0xff] }
  0x2d   : > { %v71_v13 = vld [vmem:[#allocation2] sm:$0xff]  ;;  %v72_v14 = vld [vmem:[#allocation2 + $0x8] sm:$0xff]  ;;  %57 = vperm.xlu0 %775, %v842_v5   ;;  %v646_v15 = vpack.c.bf16 %v120_v12, %v119_v9  ;;  %v121_v22 = vld [vmem:[#allocation2 + $0x190] sm:$0xff]  ;;  %v618_v24 = vpack.c.bf16 %v90_v21, %v89_v19 }
  0x2e   : > { %v616_v16 = vpack.c.bf16 %v72_v14, %v71_v13  ;;  %v103_v17 = vld [vmem:[#allocation2 + $0x100] sm:$0xff]  ;;  %v104_v18 = vld [vmem:[#allocation2 + $0x108] sm:$0xff]  ;;  %615 = vmatprep.subr.bf16.mxu0 %v614_v11  ;;  %v122_v23 = vld [vmem:[#allocation2 + $0x198] sm:$0xff] }
  0x2f   : > { %v648_v20 = vpack.c.bf16 %v104_v18, %v103_v17  ;;  %647 = vmatprep.subr.bf16.mxu1 %v646_v15  ;;  %v650_v25 = vpack.c.bf16 %v122_v23, %v121_v22  ;;  %v73_v26 = vld [vmem:[#allocation2 + $0x10] sm:$0xff]  ;;  %v74_v27 = vld [vmem:[#allocation2 + $0x18] sm:$0xff]  ;;  %v91_v31 = vld [vmem:[#allocation2 + $0xa0] sm:$0xff] }
  0x30   : > { %617 = vmatpush3.bf16.msra.mxu0 %v616_v16  ;;  %v105_v28 = vld [vmem:[#allocation2 + $0x110] sm:$0xff]  ;;  %v620_v29 = vpack.c.bf16 %v74_v27, %v73_v26  ;;  %v106_v30 = vld [vmem:[#allocation2 + $0x118] sm:$0xff]  ;;  %v92_v32 = vld [vmem:[#allocation2 + $0xa8] sm:$0xff] }
  0x31   : > { %649 = vmatpush3.bf16.msra.mxu1 %v648_v20  ;;  %619 = vmatprep.subr.bf16.mxu0 %v618_v24  ;;  %v652_v33 = vpack.c.bf16 %v106_v30, %v105_v28  ;;  %v622_v34 = vpack.c.bf16 %v92_v32, %v91_v31  ;;  %v123_v35 = vld [vmem:[#allocation2 + $0x1a0] sm:$0xff]  ;;  %v124_v36 = vld [vmem:[#allocation2 + $0x1a8] sm:$0xff]  ;;  %v93_v43 = vld [vmem:[#allocation2 + $0xb0] sm:$0xff] }
  0x32   : > { %651 = vmatprep.subr.bf16.mxu1 %v650_v25  ;;  %v75_v37 = vld [vmem:[#allocation2 + $0x20] sm:$0xff]  ;;  %v654_v38 = vpack.c.bf16 %v124_v36, %v123_v35  ;;  %v76_v39 = vld [vmem:[#allocation2 + $0x28] sm:$0xff]  ;;  %v94_v44 = vld [vmem:[#allocation2 + $0xb8] sm:$0xff] }
  0x33   : > { %v107_v40 = vld [vmem:[#allocation2 + $0x120] sm:$0xff]  ;;  %v108_v41 = vld [vmem:[#allocation2 + $0x128] sm:$0xff]  ;;  %v624_v42 = vpack.c.bf16 %v76_v39, %v75_v37  ;;  %v125_v45 = vld [vmem:[#allocation2 + $0x1b0] sm:$0xff]  ;;  %v626_v47 = vpack.c.bf16 %v94_v44, %v93_v43 }
  0x34   : > { %621 = vmatpush3.bf16.msra.mxu0 %v620_v29  ;;  %v656_v46 = vpack.c.bf16 %v108_v41, %v107_v40  ;;  %v126_v48 = vld [vmem:[#allocation2 + $0x1b8] sm:$0xff]  ;;  %v77_v49 = vld [vmem:[#allocation2 + $0x30] sm:$0xff]  ;;  %v95_v54 = vld [vmem:[#allocation2 + $0xc0] sm:$0xff] }
  0x35   : > { %653 = vmatpush3.bf16.msra.mxu1 %v652_v33  ;;  %623 = vmatprep.subr.bf16.mxu0 %v622_v34  ;;  %v78_v50 = vld [vmem:[#allocation2 + $0x38] sm:$0xff]  ;;  %v658_v51 = vpack.c.bf16 %v126_v48, %v125_v45  ;;  %v109_v52 = vld [vmem:[#allocation2 + $0x130] sm:$0xff]  ;;  %v96_v55 = vld [vmem:[#allocation2 + $0xc8] sm:$0xff] }
  0x36   : > { %655 = vmatprep.subr.bf16.mxu1 %v654_v38  ;;  %v110_v53 = vld [vmem:[#allocation2 + $0x138] sm:$0xff]  ;;  %v127_v56 = vld [vmem:[#allocation2 + $0x1c0] sm:$0xff]  ;;  %v128_v57 = vld [vmem:[#allocation2 + $0x1c8] sm:$0xff]  ;;  %v628_v58 = vpack.c.bf16 %v78_v50, %v77_v49  ;;  %v630_v60 = vpack.c.bf16 %v96_v55, %v95_v54 }
  0x37   : > { %v660_v59 = vpack.c.bf16 %v110_v53, %v109_v52  ;;  %v79_v61 = vld [vmem:[#allocation2 + $0x40] sm:$0xff]  ;;  %v80_v62 = vld [vmem:[#allocation2 + $0x48] sm:$0xff]  ;;  %v662_v0 = vpack.c.bf16 %v128_v57, %v127_v56  ;;  %v97_v7 = vld [vmem:[#allocation2 + $0xd0] sm:$0xff] }
  0x38   : > { %625 = vmatpush3.bf16.msra.mxu0 %v624_v42  ;;  %v111_v63 = vld [vmem:[#allocation2 + $0x140] sm:$0xff]  ;;  %v112_v5 = vld [vmem:[#allocation2 + $0x148] sm:$0xff]  ;;  %v98_v8 = vld [vmem:[#allocation2 + $0xd8] sm:$0xff]  ;;  %v632_v11 = vpack.c.bf16 %v80_v62, %v79_v61 }
  0x39   : > { %657 = vmatpush3.bf16.msra.mxu1 %v656_v46  ;;  %627 = vmatprep.subr.bf16.mxu0 %v626_v47  ;;  %v129_v9 = vld [vmem:[#allocation2 + $0x1d0] sm:$0xff]  ;;  %v130_v10 = vld [vmem:[#allocation2 + $0x1d8] sm:$0xff]  ;;  %v664_v12 = vpack.c.bf16 %v112_v5, %v111_v63  ;;  %v634_v13 = vpack.c.bf16 %v98_v8, %v97_v7  ;;  %v99_v19 = vld [vmem:[#allocation2 + $0xe0] sm:$0xff] }
  0x3a   : > { %659 = vmatprep.subr.bf16.mxu1 %v658_v51  ;;  %v81_v14 = vld [vmem:[#allocation2 + $0x50] sm:$0xff]  ;;  %v82_v15 = vld [vmem:[#allocation2 + $0x58] sm:$0xff]  ;;  %v666_v17 = vpack.c.bf16 %v130_v10, %v129_v9  ;;  %v100_v20 = vld [vmem:[#allocation2 + $0xe8] sm:$0xff]  ;;  %v855_v10 = vmov 1.0  }
  0x3b   : > { %v113_v16 = vld [vmem:[#allocation2 + $0x150] sm:$0xff]  ;;  %v114_v18 = vld [vmem:[#allocation2 + $0x158] sm:$0xff]  ;;  %v131_v21 = vld [vmem:[#allocation2 + $0x1e0] sm:$0xff]  ;;  %v636_v23 = vpack.c.bf16 %v82_v15, %v81_v14  ;;  %v638_v25 = vpack.c.bf16 %v100_v20, %v99_v19 }
  0x3c   : > { %629 = vmatpush3.bf16.msra.mxu0 %v628_v58  ;;  %v132_v22 = vld [vmem:[#allocation2 + $0x1e8] sm:$0xff]  ;;  %v668_v24 = vpack.c.bf16 %v114_v18, %v113_v16  ;;  %v83_v26 = vld [vmem:[#allocation2 + $0x60] sm:$0xff]  ;;  %v101_v31 = vld [vmem:[#allocation2 + $0xf0] sm:$0xff] }
  0x3d   : > { %661 = vmatpush3.bf16.msra.mxu1 %v660_v59  ;;  %631 = vmatprep.subr.bf16.mxu0 %v630_v60  ;;  %v84_v27 = vld [vmem:[#allocation2 + $0x68] sm:$0xff]  ;;  %v115_v28 = vld [vmem:[#allocation2 + $0x160] sm:$0xff]  ;;  %v670_v29 = vpack.c.bf16 %v132_v22, %v131_v21  ;;  %v102_v32 = vld [vmem:[#allocation2 + $0xf8] sm:$0xff] }
  0x3e   : > { %663 = vmatprep.subr.bf16.mxu1 %v662_v0  ;;  %v116_v30 = vld [vmem:[#allocation2 + $0x168] sm:$0xff]  ;;  %v133_v33 = vld [vmem:[#allocation2 + $0x1f0] sm:$0xff]  ;;  %v134_v34 = vld [vmem:[#allocation2 + $0x1f8] sm:$0xff]  ;;  %v640_v35 = vpack.c.bf16 %v84_v27, %v83_v26  ;;  %v642_v37 = vpack.c.bf16 %v102_v32, %v101_v31 }
  0x3f   : > { %v672_v36 = vpack.c.bf16 %v116_v30, %v115_v28  ;;  %v85_v38 = vld [vmem:[#allocation2 + $0x70] sm:$0xff]  ;;  %v86_v39 = vld [vmem:[#allocation2 + $0x78] sm:$0xff]  ;;  %v674_v41 = vpack.c.bf16 %v134_v34, %v133_v33  ;;  %v276_v43 = vld [vmem:[#allocation4 + $0x8] sm:$0xff] }
  0x40   : > { %633 = vmatpush3.bf16.msra.mxu0 %v632_v11  ;;  %v117_v40 = vld [vmem:[#allocation2 + $0x170] sm:$0xff]  ;;  %v118_v42 = vld [vmem:[#allocation2 + $0x178] sm:$0xff]  ;;  %v280_v44 = vld [vmem:[#allocation4 + $0x28] sm:$0xff]  ;;  %v644_v47 = vpack.c.bf16 %v86_v39, %v85_v38 }
  0x41   : > { %665 = vmatpush3.bf16.msra.mxu1 %v664_v12  ;;  %635 = vmatprep.subr.bf16.mxu0 %v634_v13  ;;  %v278_v45 = vld [vmem:[#allocation4 + $0x18] sm:$0xff]  ;;  %v676_v48 = vpack.c.bf16 %v118_v42, %v117_v40  ;;  %v678_v49 = vpack.c.bf16 %v280_v44, %v276_v43  ;;  %v275_v51 = vld [vmem:[#allocation4] sm:$0xff]  ;;  %v277_v53 = vld [vmem:[#allocation4 + $0x10] sm:$0xff] }
  0x42   : > { %667 = vmatprep.subr.bf16.mxu1 %v666_v17  ;;  %v282_v46 = vld [vmem:[#allocation4 + $0x38] sm:$0xff]  ;;  %v279_v52 = vld [vmem:[#allocation4 + $0x20] sm:$0xff]  ;;  %v281_v54 = vld [vmem:[#allocation4 + $0x30] sm:$0xff] }
  0x43   : > { %v710_v50 = vpack.c.bf16 %v282_v46, %v278_v45  ;;  %v284_v55 = vld [vmem:[#allocation4 + $0x48] sm:$0xff]  ;;  %v286_v57 = vld [vmem:[#allocation4 + $0x58] sm:$0xff]  ;;  %v680_v60 = vpack.c.bf16 %v279_v52, %v275_v51  ;;  %v712_v61 = vpack.c.bf16 %v281_v54, %v277_v53  ;;  %v283_v0 = vld [vmem:[#allocation4 + $0x40] sm:$0xff] }
  0x44   : > { %637 = vmatpush3.bf16.msra.mxu0 %v636_v23  ;;  %v288_v56 = vld [vmem:[#allocation4 + $0x68] sm:$0xff]  ;;  %v290_v58 = vld [vmem:[#allocation4 + $0x78] sm:$0xff]  ;;  %v287_v5 = vld [vmem:[#allocation4 + $0x60] sm:$0xff] }
  0x45   : > { %669 = vmatpush3.bf16.msra.mxu1 %v668_v24  ;;  %639 = vmatprep.subr.bf16.mxu0 %v638_v25  ;;  %v682_v62 = vpack.c.bf16 %v288_v56, %v284_v55  ;;  %v714_v63 = vpack.c.bf16 %v290_v58, %v286_v57  ;;  %v285_v7 = vld [vmem:[#allocation4 + $0x50] sm:$0xff]  ;;  %v292_v9 = vld [vmem:[#allocation4 + $0x88] sm:$0xff]  ;;  %v294_v12 = vld [vmem:[#allocation4 + $0x98] sm:$0xff]  ;;  %v684_v14 = vpack.c.bf16 %v287_v5, %v283_v0 }
  0x46   : > { %671 = vmatprep.subr.bf16.mxu1 %v670_v29  ;;  %v289_v8 = vld [vmem:[#allocation4 + $0x70] sm:$0xff]  ;;  %v296_v11 = vld [vmem:[#allocation4 + $0xa8] sm:$0xff]  ;;  %v298_v13 = vld [vmem:[#allocation4 + $0xb8] sm:$0xff] }
  0x47   : > { %v716_v15 = vpack.c.bf16 %v289_v8, %v285_v7  ;;  %v291_v16 = vld [vmem:[#allocation4 + $0x80] sm:$0xff]  ;;  %v686_v18 = vpack.c.bf16 %v296_v11, %v292_v9  ;;  %v718_v19 = vpack.c.bf16 %v298_v13, %v294_v12  ;;  %v293_v20 = vld [vmem:[#allocation4 + $0x90] sm:$0xff]  ;;  %v300_v22 = vld [vmem:[#allocation4 + $0xc8] sm:$0xff] }
  0x48   : > { %641 = vmatpush3.bf16.msra.mxu0 %v640_v35  ;;  %v295_v17 = vld [vmem:[#allocation4 + $0xa0] sm:$0xff]  ;;  %v297_v21 = vld [vmem:[#allocation4 + $0xb0] sm:$0xff]  ;;  %v304_v23 = vld [vmem:[#allocation4 + $0xe8] sm:$0xff] }
  0x49   : > { %673 = vmatpush3.bf16.msra.mxu1 %v672_v36  ;;  %643 = vmatprep.subr.bf16.mxu0 %v642_v37  ;;  %v302_v24 = vld [vmem:[#allocation4 + $0xd8] sm:$0xff]  ;;  %v688_v26 = vpack.c.bf16 %v295_v17, %v291_v16  ;;  %v720_v27 = vpack.c.bf16 %v297_v21, %v293_v20  ;;  %v299_v28 = vld [vmem:[#allocation4 + $0xc0] sm:$0xff]  ;;  %v690_v30 = vpack.c.bf16 %v304_v23, %v300_v22  ;;  %v301_v32 = vld [vmem:[#allocation4 + $0xd0] sm:$0xff] }
  0x4a   : > { %675 = vmatprep.subr.bf16.mxu1 %v674_v41  ;;  %v306_v25 = vld [vmem:[#allocation4 + $0xf8] sm:$0xff]  ;;  %v303_v29 = vld [vmem:[#allocation4 + $0xe0] sm:$0xff]  ;;  %v305_v33 = vld [vmem:[#allocation4 + $0xf0] sm:$0xff] }
  0x4b   : > { %v722_v31 = vpack.c.bf16 %v306_v25, %v302_v24  ;;  %v308_v34 = vld [vmem:[#allocation4 + $0x108] sm:$0xff]  ;;  %v310_v36 = vld [vmem:[#allocation4 + $0x118] sm:$0xff]  ;;  %v692_v38 = vpack.c.bf16 %v303_v29, %v299_v28  ;;  %v724_v39 = vpack.c.bf16 %v305_v33, %v301_v32  ;;  %v307_v40 = vld [vmem:[#allocation4 + $0x100] sm:$0xff]  ;;  %v856_v25 = vmov 0.0  }
  0x4c   : > { %645 = vmatpush3.bf16.msra.mxu0 %v644_v47  ;;  %v312_v35 = vld [vmem:[#allocation4 + $0x128] sm:$0xff]  ;;  %v314_v37 = vld [vmem:[#allocation4 + $0x138] sm:$0xff]  ;;  %v311_v41 = vld [vmem:[#allocation4 + $0x120] sm:$0xff] }
  0x4d   : > { %677 = vmatpush3.bf16.msra.mxu1 %v676_v48  ;;  %679 = vmatprep.subr.bf16.mxu0 %v678_v49  ;;  %v694_v42 = vpack.c.bf16 %v312_v35, %v308_v34  ;;  %v726_v43 = vpack.c.bf16 %v314_v37, %v310_v36  ;;  %v309_v44 = vld [vmem:[#allocation4 + $0x110] sm:$0xff]  ;;  %v316_v46 = vld [vmem:[#allocation4 + $0x148] sm:$0xff]  ;;  %v318_v48 = vld [vmem:[#allocation4 + $0x158] sm:$0xff] }
  0x4e   : > { %711 = vmatprep.subr.bf16.mxu1 %v710_v50  ;;  %v313_v45 = vld [vmem:[#allocation4 + $0x130] sm:$0xff]  ;;  %v320_v47 = vld [vmem:[#allocation4 + $0x168] sm:$0xff]  ;;  %v322_v49 = vld [vmem:[#allocation4 + $0x178] sm:$0xff]  ;;  %v696_v50 = vpack.c.bf16 %v311_v41, %v307_v40 }
  0x4f   : > { %v728_v51 = vpack.c.bf16 %v313_v45, %v309_v44  ;;  %v315_v52 = vld [vmem:[#allocation4 + $0x140] sm:$0xff]  ;;  %v698_v54 = vpack.c.bf16 %v320_v47, %v316_v46  ;;  %v730_v55 = vpack.c.bf16 %v322_v49, %v318_v48  ;;  %v317_v56 = vld [vmem:[#allocation4 + $0x150] sm:$0xff]  ;;  %v324_v58 = vld [vmem:[#allocation4 + $0x188] sm:$0xff] }
  0x50   : > { %v319_v53 = vld [vmem:[#allocation4 + $0x160] sm:$0xff]  ;;  %v321_v57 = vld [vmem:[#allocation4 + $0x170] sm:$0xff]  ;;  %v332_v13 = vld [vmem:[#allocation4 + $0x1c8] sm:$0xff] }
  0x51   : > { %v323_v0 = vld [vmem:[#allocation4 + $0x180] sm:$0xff]  ;;  %v325_v9 = vld [vmem:[#allocation4 + $0x190] sm:$0xff]  ;;  %v338_v17 = vld [vmem:[#allocation4 + $0x1f8] sm:$0xff] }
  0x52   : > { %v327_v8 = vld [vmem:[#allocation4 + $0x1a0] sm:$0xff]  ;;  %v333_v22 = vld [vmem:[#allocation4 + $0x1d0] sm:$0xff] }
  0x53   : > { %v704_v11 = vpack.c.bf16 %v327_v8, %v323_v0  ;;  %v337_v23 = vld [vmem:[#allocation4 + $0x1f0] sm:$0xff] }
  0x54   : > { %v740_v24 = vpack.c.bf16 %v337_v23, %v333_v22 }
  0xac   : > { %v58_v59 = vpop.permute.xlu0 %57 }
  0xad   : > { %vm60_vm0 = vcmp.eq.s32.totalorder %v904_v2, %v58_v59  ;;  %vm62_vm1 = vcmp.eq.s32.totalorder %v910_v4, %v58_v59  ;;  %vm59_vm2 = vcmp.eq.s32.totalorder %v901_v1, %v58_v59  ;;  %vm61_vm3 = vcmp.eq.s32.totalorder %v907_v3, %v58_v59  ;;  %v328_v59 = vld [vmem:[#allocation4 + $0x1a8] sm:$0xff] }
  0xae   : > { %540 = vmatprep.mubr.msk.f32.mxu0 %vm60_vm0, %v855_v10  ;;  %542 = vmatprep.mubr.msk.f32.mxu1 %vm62_vm1, %v855_v10  ;;  %v702_v5 = vpack.c.bf16 %v328_v59, %v324_v58 }
  0xaf   : > { %541 = vmatmul.mubr.msk.f32.vlgmr.msra.gmra.mrb[0].mxu0 %vm59_vm2, %v855_v10  ;;  %543 = vmatmul.mubr.msk.f32.vlgmr.msra.gmra.mrb[0].mxu1 %vm61_vm3, %v855_v10  ;;  %v329_v10 = vld [vmem:[#allocation4 + $0x1b0] sm:$0xff] }
  0xb0   : > { %681 = vmatpush1.bf16.msra.mxu0 %v680_v60  ;;  %713 = vmatpush1.bf16.msra.mxu1 %v712_v61  ;;  %v326_v60 = vld [vmem:[#allocation4 + $0x198] sm:$0xff]  ;;  %v736_v12 = vpack.c.bf16 %v329_v10, %v325_v9 }
  0xb1   : > { %683 = vmatprep.subr.bf16.mxu0 %v682_v62  ;;  %715 = vmatprep.subr.bf16.mxu1 %v714_v63  ;;  %v330_v61 = vld [vmem:[#allocation4 + $0x1b8] sm:$0xff]  ;;  %v700_v62 = vpack.c.bf16 %v319_v53, %v315_v52  ;;  %v732_v63 = vpack.c.bf16 %v321_v57, %v317_v56 }
  0xb2   : > { %v734_v7 = vpack.c.bf16 %v330_v61, %v326_v60  ;;  %403 = vmatprep.mubr.f32.mxu0 %v856_v25  ;;  %474 = vmatprep.mubr.f32.mxu1 %v856_v25 }
  0xb4   : > { %685 = vmatpush1.bf16.msra.mxu0 %v684_v14  ;;  %717 = vmatpush1.bf16.msra.mxu1 %v716_v15  ;;  %v336_v14 = vld [vmem:[#allocation4 + $0x1e8] sm:$0xff]  ;;  %v334_v15 = vld [vmem:[#allocation4 + $0x1d8] sm:$0xff] }
  0xb5   : > { %687 = vmatprep.subr.bf16.mxu0 %v686_v18  ;;  %719 = vmatprep.subr.bf16.mxu1 %v718_v19  ;;  %v706_v16 = vpack.c.bf16 %v336_v14, %v332_v13  ;;  %v331_v18 = vld [vmem:[#allocation4 + $0x1c0] sm:$0xff]  ;;  %v738_v20 = vpack.c.bf16 %v338_v17, %v334_v15 }
  0xb6   : > { %v335_v19 = vld [vmem:[#allocation4 + $0x1e0] sm:$0xff] }
  0xb7   : > { %v708_v21 = vpack.c.bf16 %v335_v19, %v331_v18 }
  0xb8   : > { %689 = vmatpush1.bf16.msra.mxu0 %v688_v26  ;;  %721 = vmatpush1.bf16.msra.mxu1 %v720_v27 }
  0xb9   : > { %691 = vmatprep.subr.bf16.mxu0 %v690_v30  ;;  %723 = vmatprep.subr.bf16.mxu1 %v722_v31 }
  0xbc   : > { %693 = vmatpush1.bf16.msra.mxu0 %v692_v38  ;;  %725 = vmatpush1.bf16.msra.mxu1 %v724_v39 }
  0xbd   : > { %695 = vmatprep.subr.bf16.mxu0 %v694_v42  ;;  %727 = vmatprep.subr.bf16.mxu1 %v726_v43 }
  0xc0   : > { %697 = vmatpush1.bf16.msra.mxu0 %v696_v50  ;;  %729 = vmatpush1.bf16.msra.mxu1 %v728_v51 }
  0xc1   : > { %699 = vmatprep.subr.bf16.mxu0 %v698_v54  ;;  %731 = vmatprep.subr.bf16.mxu1 %v730_v55  ;;  %v514_v55 = vstv %s846_s2  ;;  %s53_s2 = sadd.s32 1, %s846_s2  }
  0xc2   : > { %vm515_vm12 = vcmp.eq.s32.totalorder %v901_v1, %v514_v55  ;;  %p50_p2 = scmp.ge.s32.totalorder %s53_s2, 4  }
  0xc3   :  { %vm517_vm13 = vcmask (%p50_p2), 31744  }
  0xc4   : > { %701 = vmatpush1.bf16.msra.mxu0 %v700_v62  ;;  %733 = vmatpush1.bf16.msra.mxu1 %v732_v63 }
  0xc5   : > { %703 = vmatprep.subr.bf16.mxu0 %v702_v5  ;;  %735 = vmatprep.subr.bf16.mxu1 %v734_v7 }
  0xc8   : > { %705 = vmatpush1.bf16.msra.mxu0 %v704_v11  ;;  %737 = vmatpush1.bf16.msra.mxu1 %v736_v12 }
  0xc9   : > { %707 = vmatprep.subr.bf16.mxu0 %v706_v16  ;;  %739 = vmatprep.subr.bf16.mxu1 %v738_v20 }
  0xcc   : > { %709 = vmatpush1.bf16.msra.mxu0 %v708_v21  ;;  %741 = vmatpush1.bf16.msra.mxu1 %v740_v24 }
 0x182   : > { %v576_v26 = vpop.f32.mrb[0].mxu0  ;;  %v611_v27 = vpop.f32.mrb[0].mxu1 }
 0x183   : > { %v577_v28 = vpop.f32.mrb[1].mxu0  ;;  %v612_v29 = vpop.f32.mrb[1].mxu1 }
 0x184   : > { %v578_v30 = vadd.f32 %v577_v28, %v576_v26  ;;  %v613_v31 = vadd.f32 %v612_v29, %v611_v27 }
 0x186   : > { %v272_v32 = vadd.f32 %v613_v31, %v578_v30 }
 0x188   : > { %404 = vmatmul.mubr.f32.vlgmr.msra.gmra.mrb[2].mxu0 %v272_v32  ;;  %475 = vmatmul.mubr.f32.vlgmr.msra.gmra.mrb[2].mxu1 %v272_v32 }
 0x25b   : > { %v405_v33 = vpop.f32.mrb[2].mxu0  ;;  %v476_v34 = vpop.f32.mrb[2].mxu1 }
 0x25c   : > { %v407_v35 = vpop.f32.mrb[3].mxu0  ;;  %v478_v36 = vpop.f32.mrb[3].mxu1 }
 0x25d   : > { %v481_v37 = vmax.f32 %v405_v33, %v407_v35  ;;  %v482_v38 = vmax.f32 %v476_v34, %v478_v36 }
 0x25f   : > { %v483_v39 = vmax.f32 %v481_v37, %v482_v38 }
 0x261   : > { %484 = vmax.xlane.f32.xlu0 %v483_v39 }
 0x2ee   : > { %v485_v40 = vpop.xlane.xlu0 %484 }
 0x2ef   : > { %vm486_vm4 = vcmp.eq.f32.partialorder %v405_v33, %v485_v40  ;;  %vm487_vm5 = vcmp.eq.f32.partialorder %v407_v35, %v485_v40  ;;  %vm488_vm6 = vcmp.eq.f32.partialorder %v476_v34, %v485_v40  ;;  %vm489_vm7 = vcmp.eq.f32.partialorder %v478_v36, %v485_v40 }
 0x2f0   : > { %v490_v41 = vsel %vm486_vm4, %v901_v1, 512  ;;  %v491_v42 = vsel %vm487_vm5, %v904_v2, 512  ;;  %v492_v43 = vsel %vm488_vm6, %v907_v3, 512  ;;  %v493_v44 = vsel %vm489_vm7, %v910_v4, 512 }
 0x2f1   : > { %vm494_vm8 = vcmp.lt.s32.totalorder %v490_v41, %v491_v42  ;;  %vm496_vm9 = vcmp.lt.s32.totalorder %v492_v43, %v493_v44 }
 0x2f2   : > { %v495_v45 = vsel %vm494_vm8, %v490_v41, %v491_v42  ;;  %v497_v46 = vsel %vm496_vm9, %v492_v43, %v493_v44 }
 0x2f3   : > { %vm498_vm10 = vcmp.lt.s32.totalorder %v495_v45, %v497_v46 }
 0x2f4   : > { %v499_v47 = vsel %vm498_vm10, %v495_v45, %v497_v46 }
 0x2f5   : > { %v501_v48 = vshra.s32 %v499_v47, 16  ;;  %v500_v50 = vand.u32 65535, %v499_v47 }
 0x2f7   : > { %v503_v49 = vcvt.s32.f32 %v501_v48  ;;  %v502_v52 = vcvt.s32.f32 %v500_v50 }
 0x2f9   : > { %504 = vmin.xlane.f32.xlu1 %v503_v49 }
 0x386   : > { %v505_v51 = vpop.xlane.xlu1 %504 }
 0x387   : > { %vm506_vm11 = vcmp.eq.f32.partialorder %v503_v49, %v505_v51  ;;  %v511_v54 = vcvt.f32.s32 %v505_v51 }
 0x388   : > { %v507_v53 = vsel %vm506_vm11, %v502_v52, inf }
 0x389   : > { %508 = vmin.xlane.f32.xlu1 %v507_v53  ;;  %v512_v57 = vshll.u32 %v511_v54, 16 }
 0x416   : > { %v509_v56 = vpop.xlane.xlu1 %508  ;;  %52 = sbr.rel (!%p50_p2) target bundleno = 43 (0x2b), region = 47 }
 0x417   : > { %v510_v58 = vcvt.f32.s32 %v509_v56 }
 0x419   : > { %v513_v5 = vadd.s32 %v512_v57, %v510_v58  }
 0x41b   : > { %v516_v59 = vsel %vm515_vm12, %v513_v5, %v838_v6  }
 0x41c   : > { %v953_v6 = vmov %v516_v59  ;;  %518 = vst.msk [vmem:[%s952_s3] sm:$0xff] (%p50_p2), %vm517_vm13, %v516_v59 }
 0x41d   :  { %523 = vsyncpa [#allocation3], 1 }
 0x41e   :  { %524 = vsyncpa [#allocation5], 1 }

</bundles_post_ra>
